<compile_context>
chip_gen: v7x
topology: tpu7x:2x2x1
jax: 0.10.0
libtpu: 0.0.40
codegen_flags: <defaults>
</compile_context>

<pallas_src>
import jax
import jax.numpy as jnp
from jax.experimental import pallas as pl
from jax.experimental.pallas import tpu as pltpu


def conv_bn_silu_kernel(p_ref, w_ref, scale_ref, shift_ref, o_ref):
    """One (batch, M-tile) grid step.

    p_ref:     (1, KKC, MT)   bf16  -- im2col patches, contraction on sublanes
    w_ref:     (CoutP8, KKC)  bf16  -- raw weights, Cout padded to 8-multiple
    scale_ref: (CoutP8, 1)    f32   -- BN scale column (broadcast over lanes)
    shift_ref: (CoutP8, 1)    f32   -- BN shift column
    o_ref:     (1, CoutP8, MT)      -- lane-dense output tile
    """
    # Single MXU contraction: (CoutP8, KKC) @ (KKC, MT), f32 accumulate.
    acc = jnp.dot(w_ref[...], p_ref[0], preferred_element_type=jnp.float32)
    # BN affine in f32 (scale applied post-matmul for accuracy), then SiLU.
    y = acc * scale_ref[...] + shift_ref[...]
    # SiLU: y * sigmoid(y) = y / (1 + exp(-y)); exp -> EUP, approx recip -> EUP.
    y = y * pl.reciprocal(1.0 + jnp.exp(-y), approx=True)
    o_ref[0] = y.astype(o_ref.dtype)


def conv_bn_silu(x_nchw, w_oihw, gamma, beta, running_mean, running_var,
                 *, k=3, s=1, p=None, g=1, d=1, eps=1e-5, m_tile=None,
                 out_dtype=None):
    """NCHW input, OIHW weights (PyTorch conventions) -> NCHW output."""
    assert s == 1 and g == 1 and d == 1, "only stride=1, groups=1, dilation=1"
    if p is None:
        p = k // 2  # autopad, d=1
    N, Cin, H, W = x_nchw.shape
    Cout = w_oihw.shape[0]
    KKC = k * k * Cin
    CoutP8 = 8 * pl.cdiv(Cout, 8)          # sublane-dense output channels
    hw = H * W
    if out_dtype is None:
        out_dtype = x_nchw.dtype           # keep module semantics (f32 in/out)

    # M (spatial) tile on the lane axis: 256-multiples fill v6e/v7x's 256-wide
    # MXU; for small images favor pipeline depth with 128-lane tiles.
    if m_tile is None:
        if hw >= 1024:
            m_tile = 512
        elif hw >= 512:
            m_tile = 256
        else:
            m_tile = 128
    hw_pad = m_tile * pl.cdiv(hw, m_tile)

    # ---- plain-JAX layout plumbing (no flops beyond the exact BN affine) ----
    # im2col built directly from NCHW: tap order (kh, kw, cin) on the
    # contraction axis, spatial flattened on the lane axis.
    x_pad = jnp.pad(x_nchw, ((0, 0), (0, 0), (p, p), (p, p)))
    taps = [x_pad[:, :, kh:kh + H, kw:kw + W] for kh in range(k) for kw in range(k)]
    patches = jnp.concatenate(taps, axis=1).reshape(N, KKC, hw)
    patches = patches.astype(jnp.bfloat16)                    # bf16 MXU operand
    if hw_pad != hw:
        patches = jnp.pad(patches, ((0, 0), (0, 0), (0, hw_pad - hw)))

    # Weights: (Cout, Cin, k, k) -> (Cout, kh, kw, cin) -> (Cout, KKC), bf16.
    wT = jnp.transpose(w_oihw, (0, 2, 3, 1)).reshape(Cout, KKC).astype(jnp.bfloat16)
    if CoutP8 != Cout:
        wT = jnp.pad(wT, ((0, CoutP8 - Cout), (0, 0)))

    # BN affine (eval mode), kept in f32 and applied post-matmul in-kernel.
    scale = (gamma / jnp.sqrt(running_var + eps)).astype(jnp.float32)
    shift = (beta - running_mean * scale).astype(jnp.float32)
    scale_col = jnp.pad(scale, (0, CoutP8 - Cout)).reshape(CoutP8, 1)
    shift_col = jnp.pad(shift, (0, CoutP8 - Cout)).reshape(CoutP8, 1)

    grid = (N, hw_pad // m_tile)
    out = pl.pallas_call(
        conv_bn_silu_kernel,
        out_shape=jax.ShapeDtypeStruct((N, CoutP8, hw_pad), out_dtype),
        grid=grid,
        in_specs=[
            pl.BlockSpec((1, KKC, m_tile), lambda n, m: (n, 0, m)),
            pl.BlockSpec((CoutP8, KKC), lambda n, m: (0, 0)),
            pl.BlockSpec((CoutP8, 1), lambda n, m: (0, 0)),
            pl.BlockSpec((CoutP8, 1), lambda n, m: (0, 0)),
        ],
        out_specs=pl.BlockSpec((1, CoutP8, m_tile), lambda n, m: (n, 0, m)),
        compiler_params=pltpu.CompilerParams(
            dimension_semantics=("parallel", "parallel"),
            vmem_limit_bytes=32 * 1024 * 1024),
    )(patches, wT, scale_col, shift_col)

    # Undo padding: slice real channels / spatial; already channels-first.
    out = out[:, :Cout, :hw].reshape(N, Cout, H, W)
    return out


def _reference(x_nchw, w_oihw, gamma, beta, running_mean, running_var,
               *, k=3, p=None, eps=1e-5):
    if p is None:
        p = k // 2
    x_nhwc = jnp.transpose(x_nchw, (0, 2, 3, 1)).astype(jnp.float32)
    w_hwio = jnp.transpose(w_oihw, (2, 3, 1, 0)).astype(jnp.float32)
    y = jax.lax.conv_general_dilated(
        x_nhwc, w_hwio, window_strides=(1, 1), padding=((p, p), (p, p)),
        dimension_numbers=("NHWC", "HWIO", "NHWC"))
    scale = gamma / jnp.sqrt(running_var + eps)
    shift = beta - running_mean * scale
    y = y * scale + shift
    y = y * jax.nn.sigmoid(y)
    return jnp.transpose(y, (0, 3, 1, 2))


if __name__ == "__main__":
    # Conv(c1=4, c2=8, k=3) -> autopad p=1, stride 1, groups 1, dilation 1, SiLU.
    N, C1, H, W = 2, 4, 16, 16
    C2, K = 8, 3

    key = jax.random.PRNGKey(0)
    kx, kw = jax.random.split(key)
    x = jax.random.normal(kx, (N, C1, H, W), dtype=jnp.float32)
    w = 0.1 * jax.random.normal(kw, (C2, C1, K, K), dtype=jnp.float32)  # OIHW, bias=False

    # Deterministic BatchNorm2d parameters (eval-mode / running-stat semantics).
    gamma = 1.0 + 0.1 * jnp.arange(C2, dtype=jnp.float32)
    beta = 0.05 * jnp.arange(C2, dtype=jnp.float32)
    running_mean = 0.01 * jnp.arange(C2, dtype=jnp.float32)
    running_var = 1.0 + 0.02 * jnp.arange(C2, dtype=jnp.float32)

    out = conv_bn_silu(x, w, gamma, beta, running_mean, running_var, k=K)
    out = jax.block_until_ready(out)

    ref = _reference(x, w, gamma, beta, running_mean, running_var, k=K)
    assert out.shape == (N, C2, H, W)
    max_err = float(jnp.max(jnp.abs(out - ref)))
    mean_err = float(jnp.mean(jnp.abs(out - ref)))
    # bf16 MXU operands with f32 accumulation + approx reciprocal vs all-f32 ref.
    assert max_err < 5e-2, f"mismatch vs reference conv: max_err={max_err}"
    assert mean_err < 1e-2, f"mismatch vs reference conv: mean_err={mean_err}"

    print("KERNEL_OK")
</pallas_src>

<mosaic_0001>
module attributes {stable_mosaic.version = 11 : i64} {
  func.func @conv_bn_silu_kernel(%arg0: i32, %arg1: i32, %arg2: memref<1x36x128xbf16, #tpu.memory_space<vmem>>, %arg3: memref<8x36xbf16, #tpu.memory_space<vmem>>, %arg4: memref<8x1xf32, #tpu.memory_space<vmem>>, %arg5: memref<8x1xf32, #tpu.memory_space<vmem>>, %arg6: memref<1x8x128xf32, #tpu.memory_space<vmem>>) attributes {dimension_semantics = [#tpu.dimension_semantics<parallel>, #tpu.dimension_semantics<parallel>], iteration_bounds = array<i64: 2, 2>, scalar_prefetch = 0 : i64, scratch_operands = 0 : i64, tpu.core_type = #tpu.core_type<tc>, window_params = [{transform_indices = @transform_0, window_bounds = array<i64: 1, 36, 128>}, {pipeline_mode = #tpu.pipeline_mode<synchronous>, transform_indices = @transform_1, window_bounds = array<i64: 8, 36>}, {pipeline_mode = #tpu.pipeline_mode<synchronous>, transform_indices = @transform_2, window_bounds = array<i64: 8, 1>}, {pipeline_mode = #tpu.pipeline_mode<synchronous>, transform_indices = @transform_3, window_bounds = array<i64: 8, 1>}, {transform_indices = @transform_4, window_bounds = array<i64: 1, 8, 128>}]} {
    %c0 = arith.constant 0 : index
    %c0_0 = arith.constant 0 : index
    %0 = vector.load %arg3[%c0, %c0_0] : memref<8x36xbf16, #tpu.memory_space<vmem>>, vector<8x36xbf16>
    %c0_1 = arith.constant 0 : index
    %c0_2 = arith.constant 0 : index
    %c0_3 = arith.constant 0 : index
    %1 = vector.load %arg2[%c0_1, %c0_2, %c0_3] : memref<1x36x128xbf16, #tpu.memory_space<vmem>>, vector<1x36x128xbf16>
    %2 = vector.shape_cast %1 : vector<1x36x128xbf16> to vector<36x128xbf16>
    %cst = arith.constant dense<0.000000e+00> : vector<8x128xf32>
    %3 = tpu.matmul %0, %2, %cst {dimension_numbers = #tpu.dot_dimension_numbers<[1], [0], [0], [1], [0, 0, 1, 1], [], []>} : vector<8x36xbf16>, vector<36x128xbf16>, vector<8x128xf32> -> vector<8x128xf32>
    %c0_4 = arith.constant 0 : index
    %c0_5 = arith.constant 0 : index
    %4 = vector.load %arg4[%c0_4, %c0_5] : memref<8x1xf32, #tpu.memory_space<vmem>>, vector<8x1xf32>
    %5 = vector.broadcast %4 : vector<8x1xf32> to vector<8x128xf32>
    %6 = arith.mulf %3, %5 : vector<8x128xf32>
    %c0_6 = arith.constant 0 : index
    %c0_7 = arith.constant 0 : index
    %7 = vector.load %arg5[%c0_6, %c0_7] : memref<8x1xf32, #tpu.memory_space<vmem>>, vector<8x1xf32>
    %8 = vector.broadcast %7 : vector<8x1xf32> to vector<8x128xf32>
    %9 = arith.addf %6, %8 : vector<8x128xf32>
    %cst_8 = arith.constant 0.000000e+00 : f32
    %10 = vector.broadcast %cst_8 : f32 to vector<8x128xf32>
    %11 = arith.subf %10, %9 : vector<8x128xf32>
    %12 = math.exp %11 : vector<8x128xf32>
    %cst_9 = arith.constant 1.000000e+00 : f32
    %13 = vector.broadcast %cst_9 : f32 to vector<8x128xf32>
    %14 = arith.addf %13, %12 : vector<8x128xf32>
    %15 = tpu.reciprocal %14 {approx = true} : vector<8x128xf32> -> vector<8x128xf32>
    %16 = arith.mulf %9, %15 : vector<8x128xf32>
    %c0_10 = arith.constant 0 : index
    %c0_11 = arith.constant 0 : index
    %c0_12 = arith.constant 0 : index
    %17 = vector.load %arg6[%c0_10, %c0_11, %c0_12] : memref<1x8x128xf32, #tpu.memory_space<vmem>>, vector<1x8x128xf32>
    %18 = vector.shape_cast %17 : vector<1x8x128xf32> to vector<8x128xf32>
    %19 = vector.shape_cast %16 : vector<8x128xf32> to vector<1x8x128xf32>
    tpu.vector_store %arg6[%c0_10, %c0_11, %c0_12], %19 {strides = array<i32>} : memref<1x8x128xf32, #tpu.memory_space<vmem>>, vector<1x8x128xf32>,
    return
  }
  func.func @transform_0(%arg0: i32, %arg1: i32) -> (i32, i32, i32) {
    %c0_i32 = arith.constant 0 : i32
    %c0_i32_0 = arith.constant 0 : i32
    return %arg0, %c0_i32, %arg1 : i32, i32, i32
  }
  func.func @transform_1(%arg0: i32, %arg1: i32) -> (i32, i32) {
    %c0_i32 = arith.constant 0 : i32
    %c0_i32_0 = arith.constant 0 : i32
    %c0_i32_1 = arith.constant 0 : i32
    return %c0_i32, %c0_i32_0 : i32, i32
  }
  func.func @transform_2(%arg0: i32, %arg1: i32) -> (i32, i32) {
    %c0_i32 = arith.constant 0 : i32
    %c0_i32_0 = arith.constant 0 : i32
    %c0_i32_1 = arith.constant 0 : i32
    return %c0_i32, %c0_i32_0 : i32, i32
  }
  func.func @transform_3(%arg0: i32, %arg1: i32) -> (i32, i32) {
    %c0_i32 = arith.constant 0 : i32
    %c0_i32_0 = arith.constant 0 : i32
    %c0_i32_1 = arith.constant 0 : i32
    return %c0_i32, %c0_i32_0 : i32, i32
  }
  func.func @transform_4(%arg0: i32, %arg1: i32) -> (i32, i32, i32) {
    %c0_i32 = arith.constant 0 : i32
    %c0_i32_0 = arith.constant 0 : i32
    return %arg0, %c0_i32, %arg1 : i32, i32, i32
  }
}

</mosaic_0001>

<bundles_post_ra>
// kernel: tpu_custom_call.1
= control target key start
LH: loop header
LB: loop body
LE: loop exit
PB: predicated region body
PF: predicated region fallthrough
CT: control target
= control target key end

     0   :  { %9 = vsyncpa [#allocation4], 0  ;;  %s856_s0 = inlined_call_operand.vmem [shape: bf16[2,36,256], index: 0, kind: input, shape index: {}]   ;;  %s857_s1 = inlined_call_operand.vmem [shape: bf16[8,36], index: 1, kind: input, shape index: {}]   ;;  %s858_s2 = inlined_call_operand.vmem [shape: f32[8,1], index: 2, kind: input, shape index: {}]   ;;  %s859_s3 = inlined_call_operand.vmem [shape: f32[8,1], index: 3, kind: input, shape index: {}]   ;;  %s860_s4 = inlined_call_operand.hbm [shape: f32[2,8,256], index: 4, kind: output, shape index: {}]  }
   0x1   :  { %11 = vsyncpa [#allocation4 + $0x1], 0  ;;  %s698_s15 = smov 0   ;;  %s700_s16 = smov 0  }
   0x2   :  { %s702_s17 = smov 0   ;;  %s704_s18 = smov 0  }
   0x3   :  { %s706_s19 = smov 0   ;;  %s708_s20 = smov 0  }
   0x4   :  { %s710_s21 = smov 0   ;;  %s712_s22 = smov 0  }
   0x5 LB: > { %s458_s23 = sadd.s32 4294967295, %s667_s22   ;;  %s459_s24 = sadd.s32 4294967294, %s667_s22   ;;  %s667_s22 = sphi %s712_s22, %s17_s22   ;;  %s663_s21 = sphi %s710_s21, %s870_s21   ;;  %s659_s20 = sphi %s708_s20, %s869_s20   ;;  %s655_s19 = sphi %s706_s19, %s868_s19   ;;  %s651_s18 = sphi %s704_s18, %s867_s18   ;;  %s647_s17 = sphi %s702_s17, %s866_s17   ;;  %s643_s16 = sphi %s700_s16, %s865_s16   ;;  %s639_s15 = sphi %s698_s15, %s864_s15  }
   0x6   : > { %s26_s25 = sadd.s32 1, %s659_s20  ;;  %s29_s26 = sadd.s32 1, %s663_s21 }
   0x7   : > { %p27_p0 = scmp.ge.s32.totalorder %s26_s25, 2  ;;  %p45_p1 = scmp.ne.s32.totalorder %s647_s17, %s643_s16 }
   0x8   : > { %p46_p2 = scmp.eq.s32.totalorder %s667_s22, 0  ;;  %p140_p5 = scmp.eq.s32.totalorder %s458_s23, 3 }
   0x9   : > { %s872_s25 = smov (%p27_p0, %s26_s25), 0  ;;  %s874_s26 = smov (!%p27_p0, %s29_s26), %s663_s21 }
   0xa   : > { %s34_s27 = ssub.s32 %s659_s20, %s872_s25  ;;  %p750_p3 = por %p46_p2, %p45_p1 }
   0xb   : > { %p31_p4 = scmp.ge.s32.totalorder %s874_s26, 2  ;;  %p145_p6 = scmp.ne.s32.totalorder %s643_s16, %s639_s15 }
   0xc   : > { %p146_p7 = scmp.eq.s32.totalorder %s459_s24, 3  ;;  %p758_p8 = por %p140_p5, %p45_p1 }
   0xd   : > { %s876_s26 = smov (%p31_p4, %s874_s26), 0  ;;  %s38_s7 = sadd.s32 1, %s647_s17 }
   0xe   : > { %p762_p9 = por %p146_p7, %p145_p6  ;;  %s33_s5 = ssub.s32 %s663_s21, %s876_s26 }
   0xf   : > { %s35_s6 = sor.u32 %s34_s27, %s33_s5  ;;  %p461_p11 = scmp.ge.s32.totalorder %s667_s22, 4 }
  0x10   : > { %p36_p10 = scmp.eq.s32.totalorder %s35_s6, 0 }
  0x11   : > { %171 = sbr.rel (%p461_p11) target bundleno = 34 (0x22), region = 28 }
  0x12   : > { %s770_s8 = scalar_select %p36_p10, %s647_s17, %s38_s7  }
  0x18   : > { %174 = sbr.rel (!%p750_p3) target bundleno = 34 (0x22), region = 32  ;;  %s176_s9 = sand.u32 (%p750_p3), 1, %s647_s17  }
  0x19   : > { %s489_s10 = smul.u32 (%p750_p3), 10, %s663_s21 }
  0x1a   : > { %s488_s11 = smul.u32 (%p750_p3), 20, %s176_s9 }
  0x1b   : > { %s180_s12 = sadd.s32 (%p750_p3), %s659_s20, %s489_s10 }
  0x1c   : > { %s462_s13 = sshll.u32 (%p750_p3), %s180_s12, 2  ;;  %s178_s27 = scalar_lea.vmem (%p750_p3), [#allocation2], %s488_s11 }
  0x1d   : > { %s182_s24 = scalar_lea.vmem (%p750_p3), %s856_s0, %s462_s13 }
  0x1e   : > { %v198_v0 = vld [vmem:[%s182_s24] sm:$0xf] (%p750_p3)  ;;  %v200_v1 = vld [vmem:[%s182_s24 + $0x8] sm:$0xf] (%p750_p3)  ;;  %v202_v2 = vld [vmem:[%s182_s24 + $0x10] sm:$0xf] (%p750_p3) }
  0x1f   : > { %199 = vst [vmem:[%s178_s27] sm:$0xf] %v198_v0  ;;  %201 = vst [vmem:[%s178_s27 + $0x4] sm:$0xf] %v200_v1  ;;  %v204_v3 = vld [vmem:[%s182_s24 + $0x18] sm:$0xf] }
  0x20   : > { %203 = vst [vmem:[%s178_s27 + $0x8] sm:$0xf] %v202_v2  ;;  %v206_v4 = vld [vmem:[%s182_s24 + $0x20] sm:$0xf]  ;;  %205 = vst [vmem:[%s178_s27 + $0xc] sm:$0xf] %v204_v3 }
  0x21   : > { %207 = vst [vmem:[%s178_s27 + $0x10] sm:$0xf] %v206_v4 }
  0x22 PF: > { %p463_p12 = scmp.ge.s32.totalorder %s667_s22, 1  ;;  %p239_p13 = scmp.lt.s32.totalorder %s667_s22, 5 }
  0x24   : > { %p240_p0 = pnand %p463_p12, %p239_p13 }
  0x25   : > { %s784_s28 = sand.u32 (!%p240_p0), 1, %s643_s16   ;;  %v669_v5 = vmov (!%p240_p0), 0.0   ;;  %vm670_vm0 = vmmov (!%p240_p0), 0   ;;  %v341_v6 = vld [vmem:[%s858_s2] sm:$0xff] (!%p240_p0)  ;;  %v671_v7 = vmov (!%p240_p0), 0   ;;  %vm297_vm1 = vcmask (!%p240_p0), 1041408  }
  0x26   : > { %243 = sbr.rel (%p240_p0) target bundleno = 314 (0x13a), region = 73  ;;  %478 = vmatprep.subr.bf16.mxu0 (!%p240_p0), %v669_v5  ;;  %484 = vmatprep.mubr.msk.bf16.mxu0 (!%p240_p0), %vm670_vm0, %v669_v5  ;;  %v348_v8 = vld [vmem:[%s859_s3] sm:$0xff] (!%p240_p0)  ;;  %vm293_vm2 = vcmask (!%p240_p0), 293888   ;;  %s464_s14 = sshll.u32 (!%p240_p0), %s784_s28, 3 }
  0x27   : > { %s490_s5 = smul.u32 (!%p240_p0), 20, %s784_s28  ;;  %565 = vset.pattern.permute.xlu0 (!%p240_p0), %v671_v7  ;;  %v272_v13 = vld [vmem:[%s857_s1] sm:$0xf] (!%p240_p0)  ;;  %s470_s23 = sshll.u32 (!%p240_p0), %s655_s19, 1 }
  0x28   : > { %344 = vperm.xlu0 (!%p240_p0), %565, %v341_v6   ;;  %s374_s24 = sadd.s32 (!%p240_p0), %s651_s18, %s470_s23  ;;  %s672_s18 = smov (!%p240_p0), [#allocation3]  }
  0x29   : > { %s248_s11 = scalar_lea.vmem (!%p240_p0), [#allocation2], %s490_s5  ;;  %s471_s27 = sshll.u32 (!%p240_p0), %s374_s24, 7 }
  0x2a   : > { %v566_v9 = vld [vmem:[%s248_s11] sm:$0xff] (!%p240_p0)   ;;  %v567_v10 = vld [vmem:[%s248_s11 + $0x8] sm:$0xff] (!%p240_p0)   ;;  %v568_v11 = vld [vmem:[%s248_s11 + $0x10] ss:$0 sps:$4 sm:$0x33] (!%p240_p0)   ;;  %s270_s5 = scalar_lea.vmem (!%p240_p0), [#allocation3], %s464_s14  ;;  %s802_s10 = scalar_lea.hbm (!%p240_p0), %s860_s4, %s471_s27 }
  0x2b   : > { %479 = vmatpush3.bf16.msra.mxu0 (!%p240_p0), %v566_v9  ;;  %v299_v12 = vsel (!%p240_p0), %vm297_vm1, %v568_v11, 0  ;;  %s378_s6 = sshll.u32 (!%p240_p0), %s270_s5, 4  ;;  %s363_s11 = scalar_lea.sflag (!%p240_p0), [#allocation4], %s784_s28  ;;  %s804_s6 = int_to_ptr.vmem [resolvable:$true] %s378_s6 }
  0x2c   : > { %480 = vmatprep.subr.bf16.mxu0 (!%p240_p0), %v669_v5  ;;  %351 = vperm.xlu0 (!%p240_p0), %565, %v348_v8   ;;  %s573_s12 = scalar_lea.vmem (!%p240_p0), %s804_s6, 128  ;;  %s577_s19 = sshll.u32 (!%p240_p0), %s672_s18, 4  ;;  %s578_s19 = int_to_ptr.vmem [resolvable:$false] %s577_s19 }
  0x2d   : > { %p574_p1 = scmp.ne.s32.totalorder %s804_s6, %s573_s12  ;;  %s579_s13 = scalar_lea.vmem %s578_s19, 256 }
  0x2e   : > { %p580_p4 = scmp.lt.s32.totalorder %s804_s6, %s578_s19  ;;  %p581_p5 = scmp.lt.s32.totalorder %s579_s13, %s573_s12 }
  0x2f   : > { %481 = vmatpush3.bf16.msra.mxu0 %v567_v10  ;;  %p575_p2 = pnand %p574_p1, %p758_p8 }
  0x30   : > { %482 = vmatprep.subr.bf16.mxu0 %v669_v5  ;;  %p582_p6 = por %p581_p5, %p580_p4 }
  0x31   : > { %p576_p3 = pneg %p575_p2 }
  0x33   : > { %483 = vmatpush3.bf16.msra.mxu0 %v299_v12  ;;  %p583_p7 = pnand %p582_p6, %p576_p3 }
  0x36   : > { %485 = vmatmul.mubr.msk.bf16.vlgmr.msra.gmra.mrb[0].mxu0 %vm293_vm2, %v272_v13 }
  0xa7   : > { %v345_v14 = vpop.permute.xlu0 %344 }
  0xab   : > { %v352_v18 = vpop.permute.xlu0 %351 }
 0x109   : > { %v335_v15 = vpop.f32.mrb[0].mxu0 }
 0x10a   : > { %v347_v16 = vmul.f32 %v345_v14, %v335_v15  ;;  %v486_v17 = vpop.f32.mrb[1].mxu0 }
 0x10b   : > { %v338_v19 = vpop.f32.mrb[2].mxu0 }
 0x10c   : > { %v354_v20 = vadd.f32 %v352_v18, %v347_v16  ;;  %v487_v21 = vpop.f32.mrb[3].mxu0 }
 0x10e   : > { %v355_v22 = vsub.f32 0.0, %v354_v20 }
 0x110   : > { %v356_v23 = vmul.f32 1.442695, %v355_v22 }
 0x112   : > { %569 = vpow2.f32 %v356_v23 }
 0x11c   : > { %v570_v24 = vpop.eup %569 }
 0x11d   : > { %v358_v25 = vadd.f32 1.0, %v570_v24 }
 0x11f   : > { %571 = vrcp.f32 %v358_v25 }
 0x129   : > { %v572_v26 = vpop.eup %571 }
 0x12a   : > { %v360_v27 = vmul.f32 %v572_v26, %v354_v20 }
 0x12c   : > { %361 = vst [vmem:[%s270_s5] sm:$0xff] %v360_v27 }
 0x12d   : > { %586 = shalt.err (!%p583_p7)
}
 0x12e   : > { %s587_s28 = scalar_lea.hbm %s802_s10, 128  ;;  %s591_s24 = scalar_lea.hbm %s860_s4, 512 }
 0x12f   : > { %p588_p10 = scmp.ne.s32.totalorder %s802_s10, %s587_s28  ;;  %p592_p13 = scmp.lt.u32.totalorder %s802_s10, %s860_s4 }
 0x130   : > { %p593_p0 = scmp.lt.u32.totalorder %s591_s24, %s587_s28  ;;  %p595_p2 = scmp.lt.u32.totalorder %s587_s28, %s802_s10 }
 0x131   : > { %p589_p11 = pnand %p588_p10, %p758_p8 }
 0x132   : > { %p594_p1 = por %p593_p0, %p592_p13 }
 0x133   : > { %p590_p12 = pneg %p589_p11 }
 0x134   : > { %p596_p3 = por %p595_p2, %p594_p1 }
 0x136   : > { %p597_p4 = pnand %p596_p3, %p590_p12 }
 0x138   : > { %600 = shalt.err (!%p597_p4)
}
 0x139   : > { %491 = dma.vmem_to_hbm [thread:$0]  (%p758_p8), %s804_s6, 128, %s802_s10, %s363_s11  }
 0x13a PF: > { %p497_p5 = scmp.ge.s32.totalorder %s667_s22, 2  ;;  %s390_s7 = sand.u32 1, %s639_s15  }
 0x13b   : > { %s391_s9 = scalar_lea.sflag [#allocation4], %s390_s7 }
 0x13c   : > { %p494_p6 = pnand %p497_p5, %p762_p9 }
 0x13e   : > { %634 = dma.done.wait (!%p494_p6), %s391_s9, 128  }
 0x13f   : > { %636 = vsyncadd (!%p494_p6), %s391_s9, 4294967168  ;;  %s17_s22 = sadd.s32 1, %s667_s22   ;;  %s864_s15 = smov %s643_s16 }
 0x140   : > { %p14_p7 = scmp.ge.s32.totalorder %s17_s22, 6   ;;  %s865_s16 = smov %s647_s17 }
 0x141   : > { %s866_s17 = smov %s770_s8  ;;  %s867_s18 = smov %s659_s20 }
 0x142   : > { %s868_s19 = smov %s663_s21  ;;  %s869_s20 = smov %s872_s25 }
 0x143   : > { %s870_s21 = smov %s876_s26  ;;  %16 = sbr.rel (!%p14_p7) target bundleno = 5 (0x5), region = 117 }
 0x14a   :  { %396 = vsyncpa [#allocation4], 1 }
 0x14b   :  { %398 = vsyncpa [#allocation4 + $0x1], 1 }

</bundles_post_ra>
